<compile_context>
chip_gen: v5e
topology: v5e:2x2
jax: 0.10.0
libtpu: 0.0.40
codegen_flags: <defaults>
</compile_context>

<pallas_src>
import jax
import jax.numpy as jnp
from jax.experimental import pallas as pl
from jax.experimental.pallas import tpu as pltpu


_TC_MAX = 32           # max time steps per grid iteration
_VMEM_BUDGET = 48 << 20  # conservative buffer budget (fits v7x's 64 MiB VMEM)


def _round_up(x, m):
    return (x + m - 1) // m * m


def _num_tensorcores():
    """Best-effort TensorCores-per-chip (2 on v7x, else 1). Safe fallback: 1."""
    try:
        info = pltpu.get_tpu_info()
        for name in ("num_cores", "core_count", "num_tensorcores",
                     "tensorcores_per_chip"):
            n = getattr(info, name, None)
            if isinstance(n, int) and 1 <= n <= 8:
                return n
    except Exception:
        pass
    return 1


def _pick_time_chunk(T, Bt, Hp):
    """Largest Tc <= _TC_MAX that fits the VMEM budget, then balanced so the
    padded tail is minimal (Tc * n_chunks - T < n_chunks)."""
    fixed = Hp * Hp * 2 + 2 * Bt * Hp * 4        # bf16 W_hh + f32 h0 + f32 scratch
    tc = max(1, min(T, _TC_MAX))
    while tc > 1 and fixed + 4 * tc * Bt * Hp * 2 > _VMEM_BUDGET:
        tc //= 2                                  # 2 in + 2 out bf16 chunk buffers
    n_chunks = -(-T // tc)
    tc = -(-T // n_chunks)                        # balanced: pad < n_chunks steps
    return tc, n_chunks


def _rnn_layer_kernel(xw_ref, w_hh_ref, h0_ref, out_ref, h_scratch):
    """One RNN layer, Tc time steps per grid iteration, one batch tile.

    xw_ref   : (Tc, Bt, Hp) bf16  precomputed x_t @ W_ih^T + (b_ih + b_hh)
    w_hh_ref : (Hp, Hp)     bf16  hidden->hidden weights (pre-transposed)
    h0_ref   : (Bt, Hp)     f32   initial hidden state
    out_ref  : (Tc, Bt, Hp) bf16  hidden state at every step (layer output)
    h_scratch: (Bt, Hp)     f32   hidden-state carry across time chunks
    """
    @pl.when(pl.program_id(1) == 0)           # first time chunk of this batch tile
    def _():
        h_scratch[...] = h0_ref[...]

    tc = xw_ref.shape[0]

    def step(i, h_prev):
        # bf16 MXU dot with f32 accumulation; weights stay in VMEM (no vreg
        # hoist -> no spills for Hp > 128).  Bias already folded into xw.
        hh = jnp.dot(h_prev.astype(jnp.bfloat16), w_hh_ref[...],
                     preferred_element_type=jnp.float32)
        # add + tanh in f32 (v5e VPU/EUP have no bf16 path anyway)
        h_new = jnp.tanh(xw_ref[i].astype(jnp.float32) + hh)
        out_ref[i] = h_new.astype(out_ref.dtype)   # bf16 store (stream dtype)
        return h_new

    # Serial dependence: only the out_ref store can overlap the next step, so
    # partial unroll (8) is enough to amortize loop overhead without blowing
    # up live ranges.
    h_scratch[...] = jax.lax.fori_loop(0, tc, step, h_scratch[...], unroll=8)


def _rnn_layer(x_tbc, w_ih, w_hh, bias, h0):
    """Run one RNN layer over the full sequence.

    x_tbc: (T, B, I) time-major input (f32 or bf16)
    w_ih : (I, H), w_hh: (H, H) (both pre-transposed), bias: (H,) combined
    h0   : (B, H) f32
    returns out (T, B, H) bf16, h_last (B, H) bf16
    """
    T, B, _ = x_tbc.shape
    H = w_hh.shape[0]

    # Hoisted, time-invariant input projection (+ combined bias): one big
    # bf16 MXU matmul (f32 accumulation) instead of T tiny per-step matmuls.
    xw = (jnp.dot(x_tbc.reshape(T * B, -1).astype(jnp.bfloat16),
                  w_ih.astype(jnp.bfloat16),
                  preferred_element_type=jnp.float32)
          + bias).reshape(T, B, H)

    # Lane/sublane-dense padding: H -> multiple of 128 (lanes), B -> multiple
    # of 8 (sublanes).  Zero padding is exact for the recurrence.
    Hp = _round_up(H, 128)
    Bp = _round_up(B, 8)

    # Optional batch tiling across TensorCores (v7x): independent across B.
    n_cores = _num_tensorcores()
    if n_cores > 1 and Bp >= 8 * n_cores:
        n_bt = n_cores
        Bt = _round_up(-(-Bp // n_bt), 8)
        Bp = Bt * n_bt
    else:
        n_bt, Bt = 1, Bp

    Tc, n_chunks = _pick_time_chunk(T, Bt, Hp)
    Tp = Tc * n_chunks

    xw_p = jnp.pad(xw, ((0, Tp - T), (0, Bp - B), (0, Hp - H))).astype(jnp.bfloat16)
    w_hh_p = jnp.pad(w_hh.astype(jnp.bfloat16), ((0, Hp - H), (0, Hp - H)))
    h0_p = jnp.pad(h0.astype(jnp.float32), ((0, Bp - B), (0, Hp - H)))

    # VMEM budget: single-buffered weights/h0, double-buffered bf16 chunks.
    total_bytes = (Hp * Hp * 2 + Bt * Hp * 4 + Bt * Hp * 4
                   + 4 * Tc * Bt * Hp * 2)
    vmem_limit = int(min(max(32 << 20, total_bytes + (8 << 20)), 120 << 20))

    out_p = pl.pallas_call(
        _rnn_layer_kernel,
        out_shape=jax.ShapeDtypeStruct((Tp, Bp, Hp), jnp.bfloat16),
        grid_spec=pltpu.PrefetchScalarGridSpec(
            num_scalar_prefetch=0,
            grid=(n_bt, n_chunks),
            in_specs=[
                pl.BlockSpec((Tc, Bt, Hp), lambda b, c: (c, b, 0)),
                # Constant-index weight block: single-buffer it so it doesn't
                # burn 2x VMEM (critical on v7x's 64 MiB at large H).
                pl.BlockSpec((Hp, Hp), lambda b, c: (0, 0),
                             pipeline_mode=pl.Buffered(1)),
                pl.BlockSpec((Bt, Hp), lambda b, c: (b, 0),
                             pipeline_mode=pl.Buffered(1)),
            ],
            out_specs=pl.BlockSpec((Tc, Bt, Hp), lambda b, c: (c, b, 0)),
            scratch_shapes=[pltpu.VMEM((Bt, Hp), jnp.float32)],
        ),
        compiler_params=pltpu.CompilerParams(
            # batch tiles are independent; time axis carries the recurrence
            dimension_semantics=("parallel", "arbitrary"),
            vmem_limit_bytes=vmem_limit),
    )(xw_p, w_hh_p, h0_p)

    out = out_p[:T, :B, :H]
    h_last = out[T - 1]   # final hidden state == last valid output row
    return out, h_last


def init_vanilla_rnn_params(key, input_size, hidden_size, n_layers):
    """Deterministic PyTorch-style init: U(-1/sqrt(H), 1/sqrt(H))."""
    stdv = 1.0 / jnp.sqrt(jnp.float32(hidden_size))
    params = []
    for layer in range(n_layers):
        in_sz = input_size if layer == 0 else hidden_size
        key, k1, k2, k3, k4 = jax.random.split(key, 5)
        w_ih = jax.random.uniform(k1, (hidden_size, in_sz), jnp.float32, -stdv, stdv)
        w_hh = jax.random.uniform(k2, (hidden_size, hidden_size), jnp.float32, -stdv, stdv)
        b_ih = jax.random.uniform(k3, (hidden_size,), jnp.float32, -stdv, stdv)
        b_hh = jax.random.uniform(k4, (hidden_size,), jnp.float32, -stdv, stdv)
        params.append({
            # pre-transpose so forward computes x @ w_ih, h @ w_hh directly
            "w_ih": w_ih.T,          # (in_sz, H)
            "w_hh": w_hh.T,          # (H, H)
            "bias": b_ih + b_hh,     # (H,) combined, folded into xW
        })
    return params


@jax.jit
def vanilla_rnn_forward(x, params, h0_stack):
    """x: (batch, seq, input) ; h0_stack: (n_layers, batch, hidden)."""
    x_tbc = jnp.transpose(x, (1, 0, 2))   # (T, B, I) time-major
    layer_in = x_tbc
    h_finals = []
    for l, p in enumerate(params):
        layer_out, h_last = _rnn_layer(layer_in, p["w_ih"], p["w_hh"],
                                       p["bias"], h0_stack[l])
        h_finals.append(h_last)
        layer_in = layer_out                               # bf16 stream
    out = jnp.transpose(layer_in, (1, 0, 2)).astype(jnp.float32)  # batch_first
    h = jnp.stack(h_finals, axis=0).astype(jnp.float32)           # (L, B, H)
    return out, h


def _reference_forward(x, params, h0_stack):
    """Pure-JAX f32 reference (lax.scan) for correctness checking."""
    x_tbc = jnp.transpose(x, (1, 0, 2))
    layer_in = x_tbc
    h_finals = []
    for l, p in enumerate(params):
        def step(h_prev, x_t, p=p):
            h_new = jnp.tanh(x_t @ p["w_ih"] + p["bias"] + h_prev @ p["w_hh"])
            return h_new, h_new
        h_last, outs = jax.lax.scan(step, h0_stack[l], layer_in)
        h_finals.append(h_last)
        layer_in = outs
    return jnp.transpose(layer_in, (1, 0, 2)), jnp.stack(h_finals, axis=0)


if __name__ == "__main__":
    batch, seq, input_size, hidden_size, n_layers = 2, 8, 4, 32, 2

    key = jax.random.PRNGKey(0)
    key, kx = jax.random.split(key)
    x = jax.random.normal(kx, (batch, seq, input_size), jnp.float32)

    params = init_vanilla_rnn_params(key, input_size, hidden_size, n_layers)
    # h=None in the PyTorch module -> zero initial hidden state
    h0 = jnp.zeros((n_layers, batch, hidden_size), jnp.float32)

    out, h = vanilla_rnn_forward(x, params, h0)
    out, h = jax.block_until_ready((out, h))

    out_ref, h_ref = _reference_forward(x, params, h0)
    assert out.shape == (batch, seq, hidden_size)
    assert h.shape == (n_layers, batch, hidden_size)
    # bf16 MXU dots + bf16 output stream (f32 recurrence carry) vs f32 ref
    assert jnp.allclose(out, out_ref, atol=3e-2, rtol=3e-2)
    assert jnp.allclose(h, h_ref, atol=3e-2, rtol=3e-2)

    print("KERNEL_OK")
</pallas_src>

<mosaic_0001>
module attributes {stable_mosaic.version = 11 : i64} {
  func.func @_rnn_layer_kernel(%arg0: i32, %arg1: i32, %arg2: memref<8x8x128xbf16, #tpu.memory_space<vmem>>, %arg3: memref<128x128xbf16, #tpu.memory_space<vmem>>, %arg4: memref<8x128xf32, #tpu.memory_space<vmem>>, %arg5: memref<8x8x128xbf16, #tpu.memory_space<vmem>>, %arg6: memref<8x128xf32, #tpu.memory_space<vmem>>) attributes {dimension_semantics = [#tpu.dimension_semantics<parallel>, #tpu.dimension_semantics<arbitrary>], iteration_bounds = array<i64: 1, 1>, scalar_prefetch = 0 : i64, scratch_operands = 1 : i64, tpu.core_type = #tpu.core_type<tc>, window_params = [{transform_indices = @transform_0, window_bounds = array<i64: 8, 8, 128>}, {pipeline_mode = #tpu.pipeline_mode<synchronous>, transform_indices = @transform_1, window_bounds = array<i64: 128, 128>}, {pipeline_mode = #tpu.pipeline_mode<synchronous>, transform_indices = @transform_2, window_bounds = array<i64: 8, 128>}, {transform_indices = @transform_3, window_bounds = array<i64: 8, 8, 128>}]} {
    %c0_i32 = arith.constant 0 : i32
    %0 = arith.cmpi eq, %arg1, %c0_i32 : i32
    %1 = arith.extui %0 : i1 to i32
    %c0_i32_0 = arith.constant 0 : i32
    %2 = arith.cmpi ne, %1, %c0_i32_0 : i32
    scf.if %2 {
      %c0_60 = arith.constant 0 : index
      %c0_61 = arith.constant 0 : index
      %117 = vector.load %arg4[%c0_60, %c0_61] : memref<8x128xf32, #tpu.memory_space<vmem>>, vector<8x128xf32>
      %c0_62 = arith.constant 0 : index
      %c0_63 = arith.constant 0 : index
      %118 = vector.load %arg6[%c0_62, %c0_63] : memref<8x128xf32, #tpu.memory_space<vmem>>, vector<8x128xf32>
      tpu.vector_store %arg6[%c0_62, %c0_63], %117 {strides = array<i32>} : memref<8x128xf32, #tpu.memory_space<vmem>>, vector<8x128xf32>,
    } else {
    }
    %c0 = arith.constant 0 : index
    %c0_1 = arith.constant 0 : index
    %3 = vector.load %arg6[%c0, %c0_1] : memref<8x128xf32, #tpu.memory_space<vmem>>, vector<8x128xf32>
    %c0_i32_2 = arith.constant 0 : i32
    %4 = arith.truncf %3 : vector<8x128xf32> to vector<8x128xbf16>
    %c0_3 = arith.constant 0 : index
    %c0_4 = arith.constant 0 : index
    %5 = vector.load %arg3[%c0_3, %c0_4] : memref<128x128xbf16, #tpu.memory_space<vmem>>, vector<128x128xbf16>
    %cst = arith.constant dense<0.000000e+00> : vector<8x128xf32>
    %6 = tpu.matmul %4, %5, %cst {dimension_numbers = #tpu.dot_dimension_numbers<[1], [0], [0], [1], [0, 0, 1, 1], [], []>} : vector<8x128xbf16>, vector<128x128xbf16>, vector<8x128xf32> -> vector<8x128xf32>
    %7 = arith.index_cast %c0_i32_2 : i32 to index
    %c0_5 = arith.constant 0 : index
    %c0_6 = arith.constant 0 : index
    %8 = vector.load %arg2[%7, %c0_5, %c0_6] : memref<8x8x128xbf16, #tpu.memory_space<vmem>>, vector<1x8x128xbf16>
    %9 = vector.shape_cast %8 : vector<1x8x128xbf16> to vector<8x128xbf16>
    %10 = arith.extf %9 : vector<8x128xbf16> to vector<8x128xf32>
    %11 = arith.addf %10, %6 : vector<8x128xf32>
    %12 = math.tanh %11 : vector<8x128xf32>
    %13 = arith.truncf %12 : vector<8x128xf32> to vector<8x128xbf16>
    %14 = arith.index_cast %c0_i32_2 : i32 to index
    %c0_7 = arith.constant 0 : index
    %c0_8 = arith.constant 0 : index
    %15 = vector.load %arg5[%14, %c0_7, %c0_8] : memref<8x8x128xbf16, #tpu.memory_space<vmem>>, vector<1x8x128xbf16>
    %16 = vector.shape_cast %15 : vector<1x8x128xbf16> to vector<8x128xbf16>
    %17 = vector.shape_cast %13 : vector<8x128xbf16> to vector<1x8x128xbf16>
    tpu.vector_store %arg5[%14, %c0_7, %c0_8], %17 {strides = array<i32>} : memref<8x8x128xbf16, #tpu.memory_space<vmem>>, vector<1x8x128xbf16>,
    %c1_i32 = arith.constant 1 : i32
    %18 = arith.truncf %12 : vector<8x128xf32> to vector<8x128xbf16>
    %c0_9 = arith.constant 0 : index
    %c0_10 = arith.constant 0 : index
    %19 = vector.load %arg3[%c0_9, %c0_10] : memref<128x128xbf16, #tpu.memory_space<vmem>>, vector<128x128xbf16>
    %cst_11 = arith.constant dense<0.000000e+00> : vector<8x128xf32>
    %20 = tpu.matmul %18, %19, %cst_11 {dimension_numbers = #tpu.dot_dimension_numbers<[1], [0], [0], [1], [0, 0, 1, 1], [], []>} : vector<8x128xbf16>, vector<128x128xbf16>, vector<8x128xf32> -> vector<8x128xf32>
    %21 = arith.index_cast %c1_i32 : i32 to index
    %c0_12 = arith.constant 0 : index
    %c0_13 = arith.constant 0 : index
    %22 = vector.load %arg2[%21, %c0_12, %c0_13] : memref<8x8x128xbf16, #tpu.memory_space<vmem>>, vector<1x8x128xbf16>
    %23 = vector.shape_cast %22 : vector<1x8x128xbf16> to vector<8x128xbf16>
    %24 = arith.extf %23 : vector<8x128xbf16> to vector<8x128xf32>
    %25 = arith.addf %24, %20 : vector<8x128xf32>
    %26 = math.tanh %25 : vector<8x128xf32>
    %27 = arith.truncf %26 : vector<8x128xf32> to vector<8x128xbf16>
    %28 = arith.index_cast %c1_i32 : i32 to index
    %c0_14 = arith.constant 0 : index
    %c0_15 = arith.constant 0 : index
    %29 = vector.load %arg5[%28, %c0_14, %c0_15] : memref<8x8x128xbf16, #tpu.memory_space<vmem>>, vector<1x8x128xbf16>
    %30 = vector.shape_cast %29 : vector<1x8x128xbf16> to vector<8x128xbf16>
    %31 = vector.shape_cast %27 : vector<8x128xbf16> to vector<1x8x128xbf16>
    tpu.vector_store %arg5[%28, %c0_14, %c0_15], %31 {strides = array<i32>} : memref<8x8x128xbf16, #tpu.memory_space<vmem>>, vector<1x8x128xbf16>,
    %c2_i32 = arith.constant 2 : i32
    %32 = arith.truncf %26 : vector<8x128xf32> to vector<8x128xbf16>
    %c0_16 = arith.constant 0 : index
    %c0_17 = arith.constant 0 : index
    %33 = vector.load %arg3[%c0_16, %c0_17] : memref<128x128xbf16, #tpu.memory_space<vmem>>, vector<128x128xbf16>
    %cst_18 = arith.constant dense<0.000000e+00> : vector<8x128xf32>
    %34 = tpu.matmul %32, %33, %cst_18 {dimension_numbers = #tpu.dot_dimension_numbers<[1], [0], [0], [1], [0, 0, 1, 1], [], []>} : vector<8x128xbf16>, vector<128x128xbf16>, vector<8x128xf32> -> vector<8x128xf32>
    %35 = arith.index_cast %c2_i32 : i32 to index
    %c0_19 = arith.constant 0 : index
    %c0_20 = arith.constant 0 : index
    %36 = vector.load %arg2[%35, %c0_19, %c0_20] : memref<8x8x128xbf16, #tpu.memory_space<vmem>>, vector<1x8x128xbf16>
    %37 = vector.shape_cast %36 : vector<1x8x128xbf16> to vector<8x128xbf16>
    %38 = arith.extf %37 : vector<8x128xbf16> to vector<8x128xf32>
    %39 = arith.addf %38, %34 : vector<8x128xf32>
    %40 = math.tanh %39 : vector<8x128xf32>
    %41 = arith.truncf %40 : vector<8x128xf32> to vector<8x128xbf16>
    %42 = arith.index_cast %c2_i32 : i32 to index
    %c0_21 = arith.constant 0 : index
    %c0_22 = arith.constant 0 : index
    %43 = vector.load %arg5[%42, %c0_21, %c0_22] : memref<8x8x128xbf16, #tpu.memory_space<vmem>>, vector<1x8x128xbf16>
    %44 = vector.shape_cast %43 : vector<1x8x128xbf16> to vector<8x128xbf16>
    %45 = vector.shape_cast %41 : vector<8x128xbf16> to vector<1x8x128xbf16>
    tpu.vector_store %arg5[%42, %c0_21, %c0_22], %45 {strides = array<i32>} : memref<8x8x128xbf16, #tpu.memory_space<vmem>>, vector<1x8x128xbf16>,
    %c3_i32 = arith.constant 3 : i32
    %46 = arith.truncf %40 : vector<8x128xf32> to vector<8x128xbf16>
    %c0_23 = arith.constant 0 : index
    %c0_24 = arith.constant 0 : index
    %47 = vector.load %arg3[%c0_23, %c0_24] : memref<128x128xbf16, #tpu.memory_space<vmem>>, vector<128x128xbf16>
    %cst_25 = arith.constant dense<0.000000e+00> : vector<8x128xf32>
    %48 = tpu.matmul %46, %47, %cst_25 {dimension_numbers = #tpu.dot_dimension_numbers<[1], [0], [0], [1], [0, 0, 1, 1], [], []>} : vector<8x128xbf16>, vector<128x128xbf16>, vector<8x128xf32> -> vector<8x128xf32>
    %49 = arith.index_cast %c3_i32 : i32 to index
    %c0_26 = arith.constant 0 : index
    %c0_27 = arith.constant 0 : index
    %50 = vector.load %arg2[%49, %c0_26, %c0_27] : memref<8x8x128xbf16, #tpu.memory_space<vmem>>, vector<1x8x128xbf16>
    %51 = vector.shape_cast %50 : vector<1x8x128xbf16> to vector<8x128xbf16>
    %52 = arith.extf %51 : vector<8x128xbf16> to vector<8x128xf32>
    %53 = arith.addf %52, %48 : vector<8x128xf32>
    %54 = math.tanh %53 : vector<8x128xf32>
    %55 = arith.truncf %54 : vector<8x128xf32> to vector<8x128xbf16>
    %56 = arith.index_cast %c3_i32 : i32 to index
    %c0_28 = arith.constant 0 : index
    %c0_29 = arith.constant 0 : index
    %57 = vector.load %arg5[%56, %c0_28, %c0_29] : memref<8x8x128xbf16, #tpu.memory_space<vmem>>, vector<1x8x128xbf16>
    %58 = vector.shape_cast %57 : vector<1x8x128xbf16> to vector<8x128xbf16>
    %59 = vector.shape_cast %55 : vector<8x128xbf16> to vector<1x8x128xbf16>
    tpu.vector_store %arg5[%56, %c0_28, %c0_29], %59 {strides = array<i32>} : memref<8x8x128xbf16, #tpu.memory_space<vmem>>, vector<1x8x128xbf16>,
    %c4_i32 = arith.constant 4 : i32
    %60 = arith.truncf %54 : vector<8x128xf32> to vector<8x128xbf16>
    %c0_30 = arith.constant 0 : index
    %c0_31 = arith.constant 0 : index
    %61 = vector.load %arg3[%c0_30, %c0_31] : memref<128x128xbf16, #tpu.memory_space<vmem>>, vector<128x128xbf16>
    %cst_32 = arith.constant dense<0.000000e+00> : vector<8x128xf32>
    %62 = tpu.matmul %60, %61, %cst_32 {dimension_numbers = #tpu.dot_dimension_numbers<[1], [0], [0], [1], [0, 0, 1, 1], [], []>} : vector<8x128xbf16>, vector<128x128xbf16>, vector<8x128xf32> -> vector<8x128xf32>
    %63 = arith.index_cast %c4_i32 : i32 to index
    %c0_33 = arith.constant 0 : index
    %c0_34 = arith.constant 0 : index
    %64 = vector.load %arg2[%63, %c0_33, %c0_34] : memref<8x8x128xbf16, #tpu.memory_space<vmem>>, vector<1x8x128xbf16>
    %65 = vector.shape_cast %64 : vector<1x8x128xbf16> to vector<8x128xbf16>
    %66 = arith.extf %65 : vector<8x128xbf16> to vector<8x128xf32>
    %67 = arith.addf %66, %62 : vector<8x128xf32>
    %68 = math.tanh %67 : vector<8x128xf32>
    %69 = arith.truncf %68 : vector<8x128xf32> to vector<8x128xbf16>
    %70 = arith.index_cast %c4_i32 : i32 to index
    %c0_35 = arith.constant 0 : index
    %c0_36 = arith.constant 0 : index
    %71 = vector.load %arg5[%70, %c0_35, %c0_36] : memref<8x8x128xbf16, #tpu.memory_space<vmem>>, vector<1x8x128xbf16>
    %72 = vector.shape_cast %71 : vector<1x8x128xbf16> to vector<8x128xbf16>
    %73 = vector.shape_cast %69 : vector<8x128xbf16> to vector<1x8x128xbf16>
    tpu.vector_store %arg5[%70, %c0_35, %c0_36], %73 {strides = array<i32>} : memref<8x8x128xbf16, #tpu.memory_space<vmem>>, vector<1x8x128xbf16>,
    %c5_i32 = arith.constant 5 : i32
    %74 = arith.truncf %68 : vector<8x128xf32> to vector<8x128xbf16>
    %c0_37 = arith.constant 0 : index
    %c0_38 = arith.constant 0 : index
    %75 = vector.load %arg3[%c0_37, %c0_38] : memref<128x128xbf16, #tpu.memory_space<vmem>>, vector<128x128xbf16>
    %cst_39 = arith.constant dense<0.000000e+00> : vector<8x128xf32>
    %76 = tpu.matmul %74, %75, %cst_39 {dimension_numbers = #tpu.dot_dimension_numbers<[1], [0], [0], [1], [0, 0, 1, 1], [], []>} : vector<8x128xbf16>, vector<128x128xbf16>, vector<8x128xf32> -> vector<8x128xf32>
    %77 = arith.index_cast %c5_i32 : i32 to index
    %c0_40 = arith.constant 0 : index
    %c0_41 = arith.constant 0 : index
    %78 = vector.load %arg2[%77, %c0_40, %c0_41] : memref<8x8x128xbf16, #tpu.memory_space<vmem>>, vector<1x8x128xbf16>
    %79 = vector.shape_cast %78 : vector<1x8x128xbf16> to vector<8x128xbf16>
    %80 = arith.extf %79 : vector<8x128xbf16> to vector<8x128xf32>
    %81 = arith.addf %80, %76 : vector<8x128xf32>
    %82 = math.tanh %81 : vector<8x128xf32>
    %83 = arith.truncf %82 : vector<8x128xf32> to vector<8x128xbf16>
    %84 = arith.index_cast %c5_i32 : i32 to index
    %c0_42 = arith.constant 0 : index
    %c0_43 = arith.constant 0 : index
    %85 = vector.load %arg5[%84, %c0_42, %c0_43] : memref<8x8x128xbf16, #tpu.memory_space<vmem>>, vector<1x8x128xbf16>
    %86 = vector.shape_cast %85 : vector<1x8x128xbf16> to vector<8x128xbf16>
    %87 = vector.shape_cast %83 : vector<8x128xbf16> to vector<1x8x128xbf16>
    tpu.vector_store %arg5[%84, %c0_42, %c0_43], %87 {strides = array<i32>} : memref<8x8x128xbf16, #tpu.memory_space<vmem>>, vector<1x8x128xbf16>,
    %c6_i32 = arith.constant 6 : i32
    %88 = arith.truncf %82 : vector<8x128xf32> to vector<8x128xbf16>
    %c0_44 = arith.constant 0 : index
    %c0_45 = arith.constant 0 : index
    %89 = vector.load %arg3[%c0_44, %c0_45] : memref<128x128xbf16, #tpu.memory_space<vmem>>, vector<128x128xbf16>
    %cst_46 = arith.constant dense<0.000000e+00> : vector<8x128xf32>
    %90 = tpu.matmul %88, %89, %cst_46 {dimension_numbers = #tpu.dot_dimension_numbers<[1], [0], [0], [1], [0, 0, 1, 1], [], []>} : vector<8x128xbf16>, vector<128x128xbf16>, vector<8x128xf32> -> vector<8x128xf32>
    %91 = arith.index_cast %c6_i32 : i32 to index
    %c0_47 = arith.constant 0 : index
    %c0_48 = arith.constant 0 : index
    %92 = vector.load %arg2[%91, %c0_47, %c0_48] : memref<8x8x128xbf16, #tpu.memory_space<vmem>>, vector<1x8x128xbf16>
    %93 = vector.shape_cast %92 : vector<1x8x128xbf16> to vector<8x128xbf16>
    %94 = arith.extf %93 : vector<8x128xbf16> to vector<8x128xf32>
    %95 = arith.addf %94, %90 : vector<8x128xf32>
    %96 = math.tanh %95 : vector<8x128xf32>
    %97 = arith.truncf %96 : vector<8x128xf32> to vector<8x128xbf16>
    %98 = arith.index_cast %c6_i32 : i32 to index
    %c0_49 = arith.constant 0 : index
    %c0_50 = arith.constant 0 : index
    %99 = vector.load %arg5[%98, %c0_49, %c0_50] : memref<8x8x128xbf16, #tpu.memory_space<vmem>>, vector<1x8x128xbf16>
    %100 = vector.shape_cast %99 : vector<1x8x128xbf16> to vector<8x128xbf16>
    %101 = vector.shape_cast %97 : vector<8x128xbf16> to vector<1x8x128xbf16>
    tpu.vector_store %arg5[%98, %c0_49, %c0_50], %101 {strides = array<i32>} : memref<8x8x128xbf16, #tpu.memory_space<vmem>>, vector<1x8x128xbf16>,
    %c7_i32 = arith.constant 7 : i32
    %102 = arith.truncf %96 : vector<8x128xf32> to vector<8x128xbf16>
    %c0_51 = arith.constant 0 : index
    %c0_52 = arith.constant 0 : index
    %103 = vector.load %arg3[%c0_51, %c0_52] : memref<128x128xbf16, #tpu.memory_space<vmem>>, vector<128x128xbf16>
    %cst_53 = arith.constant dense<0.000000e+00> : vector<8x128xf32>
    %104 = tpu.matmul %102, %103, %cst_53 {dimension_numbers = #tpu.dot_dimension_numbers<[1], [0], [0], [1], [0, 0, 1, 1], [], []>} : vector<8x128xbf16>, vector<128x128xbf16>, vector<8x128xf32> -> vector<8x128xf32>
    %105 = arith.index_cast %c7_i32 : i32 to index
    %c0_54 = arith.constant 0 : index
    %c0_55 = arith.constant 0 : index
    %106 = vector.load %arg2[%105, %c0_54, %c0_55] : memref<8x8x128xbf16, #tpu.memory_space<vmem>>, vector<1x8x128xbf16>
    %107 = vector.shape_cast %106 : vector<1x8x128xbf16> to vector<8x128xbf16>
    %108 = arith.extf %107 : vector<8x128xbf16> to vector<8x128xf32>
    %109 = arith.addf %108, %104 : vector<8x128xf32>
    %110 = math.tanh %109 : vector<8x128xf32>
    %111 = arith.truncf %110 : vector<8x128xf32> to vector<8x128xbf16>
    %112 = arith.index_cast %c7_i32 : i32 to index
    %c0_56 = arith.constant 0 : index
    %c0_57 = arith.constant 0 : index
    %113 = vector.load %arg5[%112, %c0_56, %c0_57] : memref<8x8x128xbf16, #tpu.memory_space<vmem>>, vector<1x8x128xbf16>
    %114 = vector.shape_cast %113 : vector<1x8x128xbf16> to vector<8x128xbf16>
    %115 = vector.shape_cast %111 : vector<8x128xbf16> to vector<1x8x128xbf16>
    tpu.vector_store %arg5[%112, %c0_56, %c0_57], %115 {strides = array<i32>} : memref<8x8x128xbf16, #tpu.memory_space<vmem>>, vector<1x8x128xbf16>,
    %c8_i32 = arith.constant 8 : i32
    %c0_58 = arith.constant 0 : index
    %c0_59 = arith.constant 0 : index
    %116 = vector.load %arg6[%c0_58, %c0_59] : memref<8x128xf32, #tpu.memory_space<vmem>>, vector<8x128xf32>
    tpu.vector_store %arg6[%c0_58, %c0_59], %110 {strides = array<i32>} : memref<8x128xf32, #tpu.memory_space<vmem>>, vector<8x128xf32>,
    return
  }
  func.func @transform_0(%arg0: i32, %arg1: i32) -> (i32, i32, i32) {
    %c0_i32 = arith.constant 0 : i32
    %c0_i32_0 = arith.constant 0 : i32
    return %arg1, %arg0, %c0_i32 : i32, i32, i32
  }
  func.func @transform_1(%arg0: i32, %arg1: i32) -> (i32, i32) {
    %c0_i32 = arith.constant 0 : i32
    %c0_i32_0 = arith.constant 0 : i32
    %c0_i32_1 = arith.constant 0 : i32
    return %c0_i32, %c0_i32_0 : i32, i32
  }
  func.func @transform_2(%arg0: i32, %arg1: i32) -> (i32, i32) {
    %c0_i32 = arith.constant 0 : i32
    %c0_i32_0 = arith.constant 0 : i32
    return %arg0, %c0_i32 : i32, i32
  }
  func.func @transform_3(%arg0: i32, %arg1: i32) -> (i32, i32, i32) {
    %c0_i32 = arith.constant 0 : i32
    %c0_i32_0 = arith.constant 0 : i32
    return %arg1, %arg0, %c0_i32 : i32, i32, i32
  }
}

</mosaic_0001>

<bundles_post_ra>
// kernel: vanilla_rnn_forward.2
= control target key start
LH: loop header
LB: loop body
LE: loop exit
PB: predicated region body
PF: predicated region fallthrough
CT: control target
= control target key end

     0   :  { %s1309_s1 = inlined_call_operand.vmem [shape: bf16[128,128], index: 1, kind: input, shape index: {}]   ;;  %s1310_s2 = inlined_call_operand.vmem [shape: f32[8,128], index: 2, kind: input, shape index: {}]   ;;  %s1311_s0 = inlined_call_operand.vmem [shape: bf16[8,8,128], index: 0, kind: input, shape index: {}]   ;;  %s1312_s3 = inlined_call_operand.vmem [shape: bf16[8,8,128], index: 3, kind: output, shape index: {}]  }
   0x1   :  { %v982_v0 = vld [vmem:[%s1309_s1 + $0x38] sm:$0xff]  ;;  %v981_v1 = vld [vmem:[%s1309_s1 + $0x30] sm:$0xff]  ;;  %v980_v4 = vld [vmem:[%s1309_s1 + $0x28] sm:$0xff] }
   0x2   :  { %86 = vmatpush.bf16.msra.mxu0 %v982_v0  ;;  %v990_v2 = vld [vmem:[%s1309_s1 + $0x38] sm:$0xff]  ;;  %v989_v3 = vld [vmem:[%s1309_s1 + $0x30] sm:$0xff]  ;;  %v988_v5 = vld [vmem:[%s1309_s1 + $0x28] sm:$0xff] }
   0x3   :  { %169 = vmatpush.bf16.msra.mxu1 %v990_v2  ;;  %v979_v6 = vld [vmem:[%s1309_s1 + $0x20] sm:$0xff]  ;;  %v978_v8 = vld [vmem:[%s1309_s1 + $0x18] sm:$0xff]  ;;  %v977_v10 = vld [vmem:[%s1309_s1 + $0x10] sm:$0xff] }
   0x4   :  { %v987_v7 = vld [vmem:[%s1309_s1 + $0x20] sm:$0xff]  ;;  %v986_v9 = vld [vmem:[%s1309_s1 + $0x18] sm:$0xff]  ;;  %v976_v11 = vld [vmem:[%s1309_s1 + $0x8] sm:$0xff] }
   0x5   :  { %v975_v12 = vld [vmem:[%s1309_s1] sm:$0xff]  ;;  %v985_v15 = vld [vmem:[%s1309_s1 + $0x10] sm:$0xff]  ;;  %v984_v16 = vld [vmem:[%s1309_s1 + $0x8] sm:$0xff] }
   0x6   :  { %87 = vmatpush.bf16.msra.mxu0 %v981_v1  ;;  %v18_v13 = vld [vmem:[%s1310_s2] sm:$0xff]  ;;  %v998_v18 = vld [vmem:[%s1309_s1 + $0x38] sm:$0xff]  ;;  %v997_v19 = vld [vmem:[%s1309_s1 + $0x30] sm:$0xff] }
   0x7   :  { %170 = vmatpush.bf16.msra.mxu1 %v989_v3  ;;  %v21_v14 = vpack.c.bf16 %v18_v13, %v18_v13  ;;  %v983_v17 = vld [vmem:[%s1309_s1] sm:$0xff]  ;;  %254 = vmatpush.bf16.msra.mxu2 %v998_v18  ;;  %v996_v20 = vld [vmem:[%s1309_s1 + $0x28] sm:$0xff]  ;;  %v994_v23 = vld [vmem:[%s1309_s1 + $0x18] sm:$0xff] }
   0x8   :  { %v995_v21 = vld [vmem:[%s1309_s1 + $0x20] sm:$0xff]  ;;  %v993_v30 = vld [vmem:[%s1309_s1 + $0x10] sm:$0xff]  ;;  %v992_v31 = vld [vmem:[%s1309_s1 + $0x8] sm:$0xff] }
   0x9   :  { %v99_v22 = vld [vmem:[%s1311_s0] sm:$0xf]  ;;  %v1006_v33 = vld [vmem:[%s1309_s1 + $0x38] sm:$0xff]  ;;  %v1005_v34 = vld [vmem:[%s1309_s1 + $0x30] sm:$0xff] }
   0xa   :  { %88 = vmatpush.bf16.msra.mxu0 %v980_v4  ;;  %v100_v24 = vunpack.c.l.bf16 %v99_v22  ;;  %v991_v32 = vld [vmem:[%s1309_s1] sm:$0xff]  ;;  %339 = vmatpush.bf16.msra.mxu3 %v1006_v33  ;;  %v1004_v35 = vld [vmem:[%s1309_s1 + $0x28] sm:$0xff]  ;;  %v1002_v38 = vld [vmem:[%s1309_s1 + $0x18] sm:$0xff] }
   0xb   :  { %171 = vmatpush.bf16.msra.mxu1 %v988_v5  ;;  %255 = vmatpush.bf16.msra.mxu2 %v997_v19  ;;  %v1003_v36 = vld [vmem:[%s1309_s1 + $0x20] sm:$0xff]  ;;  %v1001_v45 = vld [vmem:[%s1309_s1 + $0x10] sm:$0xff]  ;;  %v1000_v46 = vld [vmem:[%s1309_s1 + $0x8] sm:$0xff] }
   0xc   :  { %v769_v37 = vld [vmem:[%s1311_s0 + $0x4] sm:$0xff]   ;;  %v1014_v48 = vld [vmem:[%s1309_s1 + $0x38] sm:$0xff]  ;;  %v1013_v49 = vld [vmem:[%s1309_s1 + $0x30] sm:$0xff] }
   0xd   :  { %v184_v39 = vunpack.c.l.bf16 %v769_v37  ;;  %v999_v47 = vld [vmem:[%s1309_s1] sm:$0xff]  ;;  %v1012_v50 = vld [vmem:[%s1309_s1 + $0x28] sm:$0xff]  ;;  %v1010_v52 = vld [vmem:[%s1309_s1 + $0x18] sm:$0xff]  ;;  %v269_v53 = vunpack.c.h.bf16 %v769_v37 }
   0xe   :  { %89 = vmatpush.bf16.msra.mxu0 %v979_v6  ;;  %340 = vmatpush.bf16.msra.mxu3 %v1005_v34  ;;  %v1011_v51 = vld [vmem:[%s1309_s1 + $0x20] sm:$0xff]  ;;  %v1009_v59 = vld [vmem:[%s1309_s1 + $0x10] sm:$0xff]  ;;  %v1008_v60 = vld [vmem:[%s1309_s1 + $0x8] sm:$0xff] }
   0xf   :  { %172 = vmatpush.bf16.msra.mxu1 %v987_v7  ;;  %256 = vmatpush.bf16.msra.mxu2 %v996_v20  ;;  %v1007_v61 = vld [vmem:[%s1309_s1] sm:$0xff]  ;;  %v1022_v62 = vld [vmem:[%s1309_s1 + $0x38] sm:$0xff]  ;;  %v1021_v63 = vld [vmem:[%s1309_s1 + $0x30] sm:$0xff] }
  0x10   :  { %v1020_v0 = vld [vmem:[%s1309_s1 + $0x28] sm:$0xff]  ;;  %v1019_v1 = vld [vmem:[%s1309_s1 + $0x20] sm:$0xff]  ;;  %v1018_v3 = vld [vmem:[%s1309_s1 + $0x18] sm:$0xff] }
  0x11   :  { %v837_v2 = vld [vmem:[%s1311_s0 + $0xc] sm:$0xff]   ;;  %v1030_v13 = vld [vmem:[%s1309_s1 + $0x38] sm:$0xff] }
  0x12   :  { %90 = vmatpush.bf16.msra.mxu0 %v978_v8  ;;  %341 = vmatpush.bf16.msra.mxu3 %v1004_v35  ;;  %v354_v4 = vunpack.c.l.bf16 %v837_v2  ;;  %v439_v18 = vunpack.c.h.bf16 %v837_v2 }
  0x13   :  { %173 = vmatpush.bf16.msra.mxu1 %v986_v9  ;;  %257 = vmatpush.bf16.msra.mxu2 %v995_v21 }
  0x16   :  { %91 = vmatpush.bf16.msra.mxu0 %v977_v10  ;;  %342 = vmatpush.bf16.msra.mxu3 %v1003_v36  ;;  %v1017_v10 = vld [vmem:[%s1309_s1 + $0x10] sm:$0xff] }
  0x17   :  { %174 = vmatpush.bf16.msra.mxu1 %v985_v15  ;;  %258 = vmatpush.bf16.msra.mxu2 %v994_v23  ;;  %v1028_v15 = vld [vmem:[%s1309_s1 + $0x28] sm:$0xff] }
  0x1a   :  { %92 = vmatpush.bf16.msra.mxu0 %v976_v11  ;;  %343 = vmatpush.bf16.msra.mxu3 %v1002_v38  ;;  %v1016_v11 = vld [vmem:[%s1309_s1 + $0x8] sm:$0xff] }
  0x1b   :  { %175 = vmatpush.bf16.msra.mxu1 %v984_v16  ;;  %259 = vmatpush.bf16.msra.mxu2 %v993_v30  ;;  %v1027_v16 = vld [vmem:[%s1309_s1 + $0x20] sm:$0xff] }
  0x1c   :  { %v1035_v30 = vld [vmem:[%s1309_s1 + $0x20] sm:$0xff] }
  0x1e   :  { %93 = vmatpush.bf16.msra.mxu0 %v975_v12  ;;  %344 = vmatpush.bf16.msra.mxu3 %v1001_v45  ;;  %v1015_v12 = vld [vmem:[%s1309_s1] sm:$0xff] }
  0x1f   :  { %176 = vmatpush.bf16.msra.mxu1 %v983_v17  ;;  %260 = vmatpush.bf16.msra.mxu2 %v992_v31  ;;  %v1026_v17 = vld [vmem:[%s1309_s1 + $0x18] sm:$0xff] }
  0x20   :  { %v905_v31 = vld [vmem:[%s1311_s0 + $0x14] sm:$0xff]  }
  0x21   :  { %94 = vmatmul.bf16.vlgmr.msra.gmra.mxu0 %v21_v14  ;;  %v1029_v14 = vld [vmem:[%s1309_s1 + $0x30] sm:$0xff]  ;;  %v524_v33 = vunpack.c.l.bf16 %v905_v31 }
  0x22   :  { %345 = vmatpush.bf16.msra.mxu3 %v1000_v46  ;;  %424 = vmatpush.bf16.msrb.mxu0 %v1014_v48  ;;  %v973_v48 = vld [vmem:[%s1311_s0 + $0x1c] sm:$0xf] }
  0x23   :  { %261 = vmatpush.bf16.msra.mxu2 %v991_v32  ;;  %509 = vmatpush.bf16.msrb.mxu1 %v1022_v62  ;;  %v1034_v32 = vld [vmem:[%s1309_s1 + $0x18] sm:$0xff] }
  0x26   :  { %346 = vmatpush.bf16.msra.mxu3 %v999_v47  ;;  %425 = vmatpush.bf16.msrb.mxu0 %v1013_v49  ;;  %v694_v49 = vunpack.c.l.bf16 %v973_v48 }
  0x27   :  { %510 = vmatpush.bf16.msrb.mxu1 %v1021_v63  ;;  %594 = vmatpush.bf16.msrb.mxu2 %v1030_v13 }
  0x2a   :  { %426 = vmatpush.bf16.msrb.mxu0 %v1012_v50 }
  0x2b   :  { %511 = vmatpush.bf16.msrb.mxu1 %v1020_v0  ;;  %595 = vmatpush.bf16.msrb.mxu2 %v1029_v14 }
  0x2e   :  { %427 = vmatpush.bf16.msrb.mxu0 %v1011_v51 }
  0x2f   :  { %512 = vmatpush.bf16.msrb.mxu1 %v1019_v1  ;;  %596 = vmatpush.bf16.msrb.mxu2 %v1028_v15 }
  0x32   :  { %428 = vmatpush.bf16.msrb.mxu0 %v1010_v52 }
  0x33   :  { %513 = vmatpush.bf16.msrb.mxu1 %v1018_v3  ;;  %597 = vmatpush.bf16.msrb.mxu2 %v1027_v16 }
  0x36   :  { %429 = vmatpush.bf16.msrb.mxu0 %v1009_v59 }
  0x37   :  { %514 = vmatpush.bf16.msrb.mxu1 %v1017_v10  ;;  %598 = vmatpush.bf16.msrb.mxu2 %v1026_v17 }
  0x3a   :  { %430 = vmatpush.bf16.msrb.mxu0 %v1008_v60 }
  0x3b   :  { %515 = vmatpush.bf16.msrb.mxu1 %v1016_v11 }
  0x3e   :  { %431 = vmatpush.bf16.msrb.mxu0 %v1007_v61 }
  0x3f   :  { %516 = vmatpush.bf16.msrb.mxu1 %v1015_v12 }
  0x9e   :  { %v95_v25 = vpop.f32.mrf.mxu0 }
  0x9f   :  { %v101_v26 = vadd.f32 %v100_v24, %v95_v25  ;;  %v1025_v24 = vld [vmem:[%s1309_s1 + $0x10] sm:$0xff]  ;;  %v1024_v25 = vld [vmem:[%s1309_s1 + $0x8] sm:$0xff] }
  0xa0   :  { %599 = vmatpush.bf16.msrb.mxu2 %v1025_v24 }
  0xa1   :  { %1039 = vtanh.f32 %v101_v26  ;;  %v1023_v26 = vld [vmem:[%s1309_s1] sm:$0xff] }
  0xa4   :  { %600 = vmatpush.bf16.msrb.mxu2 %v1024_v25 }
  0xa6   :  { %v97_v27 = vpop.f32.mrf.mxu0 }
  0xa7   :  { %v1040_v28 = vpop.eup %1039  ;;  %v1038_v27 = vld [vmem:[%s1309_s1 + $0x38] sm:$0xff] }
  0xa8   :  { %v103_v29 = vpack.c.bf16 %v1040_v28, %v1040_v28  ;;  %601 = vmatpush.bf16.msrb.mxu2 %v1023_v26  ;;  %679 = vmatpush.bf16.msrb.mxu3 %v1038_v27  ;;  %v1037_v28 = vld [vmem:[%s1309_s1 + $0x30] sm:$0xff] }
  0xaa   :  { %104 = vst [vmem:[%s1312_s3] sm:$0xf] %v103_v29  ;;  %177 = vmatmul.bf16.vlgmr.msra.gmra.mxu1 %v103_v29  ;;  %v1036_v29 = vld [vmem:[%s1309_s1 + $0x28] sm:$0xff] }
  0xac   :  { %680 = vmatpush.bf16.msrb.mxu3 %v1037_v28 }
  0xb0   :  { %681 = vmatpush.bf16.msrb.mxu3 %v1036_v29 }
  0xb4   :  { %682 = vmatpush.bf16.msrb.mxu3 %v1035_v30 }
  0xb8   :  { %683 = vmatpush.bf16.msrb.mxu3 %v1034_v32 }
 0x127   :  { %v178_v40 = vpop.f32.mrf.mxu1 }
 0x128   :  { %v185_v41 = vadd.f32 %v184_v39, %v178_v40  ;;  %v1033_v39 = vld [vmem:[%s1309_s1 + $0x10] sm:$0xff]  ;;  %v1032_v40 = vld [vmem:[%s1309_s1 + $0x8] sm:$0xff] }
 0x129   :  { %684 = vmatpush.bf16.msrb.mxu3 %v1033_v39 }
 0x12a   :  { %1041 = vtanh.f32 %v185_v41  ;;  %v1031_v41 = vld [vmem:[%s1309_s1] sm:$0xff] }
 0x12d   :  { %685 = vmatpush.bf16.msrb.mxu3 %v1032_v40 }
 0x12f   :  { %v180_v42 = vpop.f32.mrf.mxu1 }
 0x130   :  { %v1042_v43 = vpop.eup %1041  ;;  %v609_v42 = vunpack.c.h.bf16 %v905_v31 }
 0x131   :  { %v187_v44 = vpack.c.bf16 %v1042_v43, %v1042_v43  ;;  %686 = vmatpush.bf16.msrb.mxu3 %v1031_v41 }
 0x133   :  { %770 = vst [vmem:[%s1312_s3 + $0x4] sm:$0xf] %v187_v44  ;;  %262 = vmatmul.bf16.vlgmr.msra.gmra.mxu2 %v187_v44 }
 0x1b6   :  { %v263_v54 = vpop.f32.mrf.mxu2 }
 0x1b7   :  { %v270_v55 = vadd.f32 %v269_v53, %v263_v54 }
 0x1b9   :  { %1043 = vtanh.f32 %v270_v55 }
 0x1be   :  { %v265_v56 = vpop.f32.mrf.mxu2 }
 0x1bf   :  { %v1044_v57 = vpop.eup %1043 }
 0x1c0   :  { %v272_v58 = vpack.c.bf16 %v1044_v57, %v1044_v57 }
 0x1c2   :  { %804 = vst [vmem:[%s1312_s3 + $0x8] sm:$0xf] %v272_v58  ;;  %347 = vmatmul.bf16.vlgmr.msra.gmra.mxu3 %v272_v58 }
 0x245   :  { %v348_v5 = vpop.f32.mrf.mxu3 }
 0x246   :  { %v355_v6 = vadd.f32 %v354_v4, %v348_v5 }
 0x248   :  { %1045 = vtanh.f32 %v355_v6 }
 0x24d   :  { %v350_v7 = vpop.f32.mrf.mxu3 }
 0x24e   :  { %v1046_v8 = vpop.eup %1045 }
 0x24f   :  { %v357_v9 = vpack.c.bf16 %v1046_v8, %v1046_v8 }
 0x251   :  { %838 = vst [vmem:[%s1312_s3 + $0xc] sm:$0xf] %v357_v9  ;;  %432 = vmatmul.bf16.vlgmr.msrb.gmra.mxu0 %v357_v9 }
 0x2ce   :  { %v433_v19 = vpop.f32.mrf.mxu0 }
 0x2cf   :  { %v440_v20 = vadd.f32 %v439_v18, %v433_v19 }
 0x2d1   :  { %1047 = vtanh.f32 %v440_v20 }
 0x2d6   :  { %v435_v21 = vpop.f32.mrf.mxu0 }
 0x2d7   :  { %v1048_v22 = vpop.eup %1047 }
 0x2d8   :  { %v442_v23 = vpack.c.bf16 %v1048_v22, %v1048_v22 }
 0x2da   :  { %872 = vst [vmem:[%s1312_s3 + $0x10] sm:$0xf] %v442_v23  ;;  %517 = vmatmul.bf16.vlgmr.msrb.gmra.mxu1 %v442_v23 }
 0x357   :  { %v518_v34 = vpop.f32.mrf.mxu1 }
 0x358   :  { %v525_v35 = vadd.f32 %v524_v33, %v518_v34 }
 0x35a   :  { %1049 = vtanh.f32 %v525_v35 }
 0x35f   :  { %v520_v36 = vpop.f32.mrf.mxu1 }
 0x360   :  { %v1050_v37 = vpop.eup %1049 }
 0x361   :  { %v527_v38 = vpack.c.bf16 %v1050_v37, %v1050_v37 }
 0x363   :  { %906 = vst [vmem:[%s1312_s3 + $0x14] sm:$0xf] %v527_v38  ;;  %602 = vmatmul.bf16.vlgmr.msrb.gmra.mxu2 %v527_v38 }
 0x3e6   :  { %v603_v43 = vpop.f32.mrf.mxu2 }
 0x3e7   :  { %v610_v44 = vadd.f32 %v609_v42, %v603_v43 }
 0x3e9   :  { %1051 = vtanh.f32 %v610_v44 }
 0x3ee   :  { %v605_v45 = vpop.f32.mrf.mxu2 }
 0x3ef   :  { %v1052_v46 = vpop.eup %1051 }
 0x3f0   :  { %v612_v47 = vpack.c.bf16 %v1052_v46, %v1052_v46 }
 0x3f2   :  { %940 = vst [vmem:[%s1312_s3 + $0x18] sm:$0xf] %v612_v47  ;;  %687 = vmatmul.bf16.vlgmr.msrb.gmra.mxu3 %v612_v47 }
 0x475   :  { %v688_v50 = vpop.f32.mrf.mxu3 }
 0x476   :  { %v695_v51 = vadd.f32 %v694_v49, %v688_v50 }
 0x478   :  { %1053 = vtanh.f32 %v695_v51 }
 0x47d   :  { %v690_v52 = vpop.f32.mrf.mxu3 }
 0x47e   :  { %v1054_v53 = vpop.eup %1053 }
 0x47f   :  { %v697_v54 = vpack.c.bf16 %v1054_v53, %v1054_v53 }
 0x481   :  { %974 = vst [vmem:[%s1312_s3 + $0x1c] sm:$0xf] %v697_v54 }

</bundles_post_ra>
